<compile_context>
chip_gen: v7x
topology: tpu7x:2x2x1
jax: 0.10.0
libtpu: 0.0.40
codegen_flags: <defaults>
</compile_context>

<pallas_src>
import functools

import jax
import jax.numpy as jnp
from jax import lax
from jax.experimental import pallas as pl
from jax.experimental.pallas import tpu as pltpu

BETA = 0.1     # temperature parameter from CELoss.__init__ (no learnable params)
_LANES = 128   # vreg lane width


def _ce_loss_kernel(policy_ref, reference_ref, reward_ref, out_ref, *, beta, true_b):
    """One (block_rows, 128) tile per grid step; out_ref is a resident (1,1) accumulator."""
    i = pl.program_id(0)

    @pl.when(i == 0)
    def _init():
        out_ref[...] = jnp.zeros_like(out_ref)

    # Widen to f32 on-chip (inputs may arrive as bf16; v5e VPU has no bf16 ALUs).
    policy = policy_ref[...].astype(jnp.float32)
    reference = reference_ref[...].astype(jnp.float32)
    y = reward_ref[...].astype(jnp.float32)   # reward.float()

    z = beta * (policy - reference)
    p = 1.0 / (1.0 + jnp.exp(-z))             # sigmoid on VPU/EUP

    # nn.BCELoss clamps the log terms at -100 (PyTorch semantics).
    log_p = jnp.maximum(jnp.log(p), -100.0)
    log_1mp = jnp.maximum(jnp.log(1.0 - p), -100.0)
    losses = -(y * log_p + (1.0 - y) * log_1mp)

    # Mask padded elements (flat index >= true batch size) out of the sum.
    rows, lanes = losses.shape
    row_ids = lax.broadcasted_iota(jnp.int32, (rows, lanes), 0)
    lane_ids = lax.broadcasted_iota(jnp.int32, (rows, lanes), 1)
    flat_idx = (i * rows + row_ids) * lanes + lane_ids
    losses = jnp.where(flat_idx < true_b, losses, 0.0)

    # Running sum across grid steps (output tile is resident on the 'arbitrary' axis).
    out_ref[...] += jnp.sum(losses, keepdims=True)

    @pl.when(i == pl.num_programs(0) - 1)
    def _finalize():
        # mean over the *true* (unpadded) batch
        out_ref[...] = out_ref[...] * (1.0 / true_b)


def ce_loss(policy_chosen_logps, reference_chosen_logps, reward,
            *, beta=BETA, block_rows=512):
    """JAX wrapper matching CELoss.forward. Inputs: (B,) arrays. Returns scalar f32."""
    b = int(policy_chosen_logps.shape[0])

    # Pack the batch onto both vreg axes: (rows, 128), rows a multiple of 8.
    rows_needed = max(1, -(-b // _LANES))
    rows_aligned = -(-rows_needed // 8) * 8
    block_rows = max(8, min(int(block_rows), rows_aligned))
    block_rows = -(-block_rows // 8) * 8                    # multiple of 8 sublanes
    rows = -(-rows_needed // block_rows) * block_rows       # multiple of block_rows
    padded_b = rows * _LANES
    num_blocks = rows // block_rows

    def prep(x):
        x = x.reshape(b)
        if padded_b != b:
            x = jnp.pad(x, (0, padded_b - b))
        return x.reshape(rows, _LANES)

    # Keep the incoming dtype (bf16 logps stay bf16 for the DMA); cast happens in-kernel.
    policy2d = prep(policy_chosen_logps)
    reference2d = prep(reference_chosen_logps)
    reward2d = prep(reward.astype(jnp.float32))             # reward.float()

    in_spec = pl.BlockSpec((block_rows, _LANES), lambda i: (i, 0))
    out_spec = pl.BlockSpec((1, 1), lambda i: (0, 0))       # resident accumulator tile

    kernel = functools.partial(_ce_loss_kernel, beta=float(beta), true_b=b)
    out = pl.pallas_call(
        kernel,
        out_shape=jax.ShapeDtypeStruct((1, 1), jnp.float32),
        grid=(num_blocks,),
        in_specs=[in_spec, in_spec, in_spec],
        out_specs=out_spec,
        compiler_params=pltpu.CompilerParams(
            dimension_semantics=("arbitrary",),             # reduction axis
            vmem_limit_bytes=32 * 1024 * 1024,              # safe on v5e/v6e/v7x; tiles are tiny
        ),
    )(policy2d, reference2d, reward2d)
    return out[0, 0]


def _ce_loss_reference(policy, reference, reward, beta=BETA):
    """Pure-JAX reference of the same math (torch sigmoid + BCELoss clamp)."""
    policy = policy.astype(jnp.float32)
    reference = reference.astype(jnp.float32)
    y = reward.astype(jnp.float32)
    z = beta * (policy - reference)
    p = 1.0 / (1.0 + jnp.exp(-z))
    losses = -(y * jnp.maximum(jnp.log(p), -100.0)
               + (1.0 - y) * jnp.maximum(jnp.log(1.0 - p), -100.0))
    return losses.mean()


if __name__ == "__main__":
    key = jax.random.PRNGKey(0)

    # (batch, dtype, block_rows) — covers: tiny batch, lane-masked padding,
    # bf16 inputs with in-kernel cast, and a multi-block grid accumulation.
    test_cfgs = [
        (8, jnp.float32, 512),
        (300, jnp.float32, 512),
        (300, jnp.bfloat16, 512),
        (2500, jnp.float32, 8),
    ]

    for idx, (batch, dtype, blk) in enumerate(test_cfgs):
        k1, k2, k3 = jax.random.split(jax.random.fold_in(key, idx), 3)
        # Log-probabilities are negative reals.
        policy_chosen_logps = (-jax.random.uniform(k1, (batch,), jnp.float32, 0.1, 5.0)
                               ).astype(dtype)
        reference_chosen_logps = (-jax.random.uniform(k2, (batch,), jnp.float32, 0.1, 5.0)
                                  ).astype(dtype)
        # Preference labels in {0, 1}.
        reward = jax.random.bernoulli(k3, 0.5, (batch,)).astype(jnp.float32)

        loss = ce_loss(policy_chosen_logps, reference_chosen_logps, reward,
                       block_rows=blk)
        jax.block_until_ready(loss)

        ref_loss = _ce_loss_reference(policy_chosen_logps, reference_chosen_logps, reward)
        assert jnp.allclose(loss, ref_loss, atol=1e-5, rtol=1e-5), \
            (batch, dtype, float(loss), float(ref_loss))

    print("KERNEL_OK")
</pallas_src>

<mosaic_0001>
module attributes {stable_mosaic.version = 11 : i64} {
  func.func @_ce_loss_kernel(%arg0: i32, %arg1: memref<8x128xf32, #tpu.memory_space<vmem>>, %arg2: memref<8x128xf32, #tpu.memory_space<vmem>>, %arg3: memref<8x128xf32, #tpu.memory_space<vmem>>, %arg4: memref<1x1xf32, #tpu.memory_space<vmem>>) attributes {dimension_semantics = [#tpu.dimension_semantics<arbitrary>], iteration_bounds = array<i64: 1>, scalar_prefetch = 0 : i64, scratch_operands = 0 : i64, tpu.core_type = #tpu.core_type<tc>, window_params = [{transform_indices = @transform_0, window_bounds = array<i64: 8, 128>}, {transform_indices = @transform_1, window_bounds = array<i64: 8, 128>}, {transform_indices = @transform_2, window_bounds = array<i64: 8, 128>}, {pipeline_mode = #tpu.pipeline_mode<synchronous>, transform_indices = @transform_3, window_bounds = array<i64: 1, 1>}]} {
    %c0_i32 = arith.constant 0 : i32
    %0 = arith.cmpi eq, %arg0, %c0_i32 : i32
    %1 = arith.extui %0 : i1 to i32
    %c0_i32_0 = arith.constant 0 : i32
    %2 = arith.cmpi ne, %1, %c0_i32_0 : i32
    scf.if %2 {
      %cst_23 = arith.constant 0.000000e+00 : f32
      %54 = vector.broadcast %cst_23 : f32 to vector<1x1xf32>
      %c0_24 = arith.constant 0 : index
      %c0_25 = arith.constant 0 : index
      %55 = vector.load %arg4[%c0_24, %c0_25] : memref<1x1xf32, #tpu.memory_space<vmem>>, vector<1x1xf32>
      tpu.vector_store %arg4[%c0_24, %c0_25], %54 {strides = array<i32>} : memref<1x1xf32, #tpu.memory_space<vmem>>, vector<1x1xf32>,
    } else {
    }
    %c0 = arith.constant 0 : index
    %c0_1 = arith.constant 0 : index
    %3 = vector.load %arg1[%c0, %c0_1] : memref<8x128xf32, #tpu.memory_space<vmem>>, vector<8x128xf32>
    %c0_2 = arith.constant 0 : index
    %c0_3 = arith.constant 0 : index
    %4 = vector.load %arg2[%c0_2, %c0_3] : memref<8x128xf32, #tpu.memory_space<vmem>>, vector<8x128xf32>
    %c0_4 = arith.constant 0 : index
    %c0_5 = arith.constant 0 : index
    %5 = vector.load %arg3[%c0_4, %c0_5] : memref<8x128xf32, #tpu.memory_space<vmem>>, vector<8x128xf32>
    %6 = arith.subf %3, %4 : vector<8x128xf32>
    %cst = arith.constant 1.000000e-01 : f32
    %7 = vector.broadcast %cst : f32 to vector<8x128xf32>
    %8 = arith.mulf %7, %6 : vector<8x128xf32>
    %cst_6 = arith.constant 0.000000e+00 : f32
    %9 = vector.broadcast %cst_6 : f32 to vector<8x128xf32>
    %10 = arith.subf %9, %8 : vector<8x128xf32>
    %11 = math.exp %10 : vector<8x128xf32>
    %cst_7 = arith.constant 1.000000e+00 : f32
    %12 = vector.broadcast %cst_7 : f32 to vector<8x128xf32>
    %13 = arith.addf %12, %11 : vector<8x128xf32>
    %cst_8 = arith.constant 1.000000e+00 : f32
    %14 = vector.broadcast %cst_8 : f32 to vector<8x128xf32>
    %15 = arith.divf %14, %13 : vector<8x128xf32>
    %16 = math.log %15 : vector<8x128xf32>
    %cst_9 = arith.constant -1.000000e+02 : f32
    %17 = vector.broadcast %cst_9 : f32 to vector<8x128xf32>
    %18 = arith.maximumf %16, %17 : vector<8x128xf32>
    %cst_10 = arith.constant 1.000000e+00 : f32
    %19 = vector.broadcast %cst_10 : f32 to vector<8x128xf32>
    %20 = arith.subf %19, %15 : vector<8x128xf32>
    %21 = math.log %20 : vector<8x128xf32>
    %cst_11 = arith.constant -1.000000e+02 : f32
    %22 = vector.broadcast %cst_11 : f32 to vector<8x128xf32>
    %23 = arith.maximumf %21, %22 : vector<8x128xf32>
    %24 = arith.mulf %5, %18 : vector<8x128xf32>
    %cst_12 = arith.constant 1.000000e+00 : f32
    %25 = vector.broadcast %cst_12 : f32 to vector<8x128xf32>
    %26 = arith.subf %25, %5 : vector<8x128xf32>
    %27 = arith.mulf %26, %23 : vector<8x128xf32>
    %28 = arith.addf %24, %27 : vector<8x128xf32>
    %cst_13 = arith.constant 0.000000e+00 : f32
    %29 = vector.broadcast %cst_13 : f32 to vector<8x128xf32>
    %30 = arith.subf %29, %28 : vector<8x128xf32>
    %31 = tpu.iota {dimensions = array<i32: 0>} : vector<8x128xi32>
    %32 = tpu.iota {dimensions = array<i32: 1>} : vector<8x128xi32>
    %c8_i32 = arith.constant 8 : i32
    %33 = arith.muli %arg0, %c8_i32 : i32
    %34 = vector.broadcast %33 : i32 to vector<8x128xi32>
    %35 = arith.addi %34, %31 : vector<8x128xi32>
    %c128_i32 = arith.constant 128 : i32
    %36 = vector.broadcast %c128_i32 : i32 to vector<8x128xi32>
    %37 = arith.muli %35, %36 : vector<8x128xi32>
    %38 = arith.addi %37, %32 : vector<8x128xi32>
    %c8_i32_14 = arith.constant 8 : i32
    %39 = vector.broadcast %c8_i32_14 : i32 to vector<8x128xi32>
    %40 = arith.cmpi slt, %38, %39 : vector<8x128xi32>
    %cst_15 = arith.constant 0.000000e+00 : f32
    %41 = vector.broadcast %cst_15 : f32 to vector<8x128xf32>
    %42 = arith.select %40, %30, %41 : vector<8x128xi1>, vector<8x128xf32>
    %c0_16 = arith.constant 0 : index
    %c0_17 = arith.constant 0 : index
    %43 = vector.load %arg4[%c0_16, %c0_17] : memref<1x1xf32, #tpu.memory_space<vmem>>, vector<1x1xf32>
    %44 = vector.shape_cast %42 : vector<8x128xf32> to vector<1x8x128xf32>
    %cst_18 = arith.constant dense<0.000000e+00> : vector<1xf32>
    %45 = vector.multi_reduction <add>, %44, %cst_18 [1, 2] : vector<1x8x128xf32> to vector<1xf32>
    %46 = vector.shape_cast %45 : vector<1xf32> to vector<1x1x1xf32>
    %47 = vector.extract %46[0, 0, 0] : f32 from vector<1x1x1xf32>
    %48 = vector.broadcast %47 : f32 to vector<1x1xf32>
    %49 = arith.addf %43, %48 : vector<1x1xf32>
    %c0_19 = arith.constant 0 : index
    %c0_20 = arith.constant 0 : index
    %50 = vector.load %arg4[%c0_19, %c0_20] : memref<1x1xf32, #tpu.memory_space<vmem>>, vector<1x1xf32>
    tpu.vector_store %arg4[%c0_19, %c0_20], %49 {strides = array<i32>} : memref<1x1xf32, #tpu.memory_space<vmem>>, vector<1x1xf32>,
    %c0_i32_21 = arith.constant 0 : i32
    %51 = arith.cmpi eq, %arg0, %c0_i32_21 : i32
    %52 = arith.extui %51 : i1 to i32
    %c0_i32_22 = arith.constant 0 : i32
    %53 = arith.cmpi ne, %52, %c0_i32_22 : i32
    scf.if %53 {
      %c0_23 = arith.constant 0 : index
      %c0_24 = arith.constant 0 : index
      %54 = vector.load %arg4[%c0_23, %c0_24] : memref<1x1xf32, #tpu.memory_space<vmem>>, vector<1x1xf32>
      %cst_25 = arith.constant 1.250000e-01 : f32
      %55 = vector.broadcast %cst_25 : f32 to vector<1x1xf32>
      %56 = arith.mulf %54, %55 : vector<1x1xf32>
      %c0_26 = arith.constant 0 : index
      %c0_27 = arith.constant 0 : index
      %57 = vector.load %arg4[%c0_26, %c0_27] : memref<1x1xf32, #tpu.memory_space<vmem>>, vector<1x1xf32>
      tpu.vector_store %arg4[%c0_26, %c0_27], %56 {strides = array<i32>} : memref<1x1xf32, #tpu.memory_space<vmem>>, vector<1x1xf32>,
    } else {
    }
    return
  }
  func.func @transform_0(%arg0: i32) -> (i32, i32) {
    %c0_i32 = arith.constant 0 : i32
    %c0_i32_0 = arith.constant 0 : i32
    return %arg0, %c0_i32 : i32, i32
  }
  func.func @transform_1(%arg0: i32) -> (i32, i32) {
    %c0_i32 = arith.constant 0 : i32
    %c0_i32_0 = arith.constant 0 : i32
    return %arg0, %c0_i32 : i32, i32
  }
  func.func @transform_2(%arg0: i32) -> (i32, i32) {
    %c0_i32 = arith.constant 0 : i32
    %c0_i32_0 = arith.constant 0 : i32
    return %arg0, %c0_i32 : i32, i32
  }
  func.func @transform_3(%arg0: i32) -> (i32, i32) {
    %c0_i32 = arith.constant 0 : i32
    %c0_i32_0 = arith.constant 0 : i32
    %c0_i32_1 = arith.constant 0 : i32
    return %c0_i32, %c0_i32_0 : i32, i32
  }
}

</mosaic_0001>

<bundles_post_ra>
// kernel: tpu_custom_call.1
= control target key start
LH: loop header
LB: loop body
LE: loop exit
PB: predicated region body
PF: predicated region fallthrough
CT: control target
= control target key end

     0   :  { %8 = vsyncpa [#allocation3], 0  ;;  %s311_s0 = inlined_call_operand.hbm [shape: f32[8,128], index: 0, kind: input, shape index: {}]   ;;  %s312_s1 = inlined_call_operand.hbm [shape: f32[8,128], index: 1, kind: input, shape index: {}]   ;;  %s313_s2 = inlined_call_operand.hbm [shape: f32[8,128], index: 2, kind: input, shape index: {}]   ;;  %s314_s3 = inlined_call_operand.hbm [shape: f32[1,1], index: 3, kind: output, shape index: {}]  }
   0x1   :  { %9 = vsyncpa [#allocation6], 0 }
   0x2   :  { %10 = vsyncpa [#allocation4], 0  ;;  %s235_s12 = smov [#allocation5]   ;;  %s236_s14 = smov [#allocation2]  }
   0x3   :  { %s27_s13 = sshll.u32 %s235_s12, 4  ;;  %s17_s15 = sshll.u32 %s236_s14, 4  ;;  %s28_s13 = int_to_ptr.vmem [resolvable:$true] %s27_s13  ;;  %s18_s15 = int_to_ptr.vmem [resolvable:$true] %s17_s15 }
   0x4   :  { %s141_s18 = scalar_lea.hbm %s312_s1, 128 }
   0x5   :  { %p142_p0 = scmp.ne.s32.totalorder %s312_s1, %s141_s18  ;;  %p145_p1 = scmp.lt.u32.totalorder %s141_s18, %s312_s1 }
   0x7   :  { %p147_p2 = pnand %p145_p1, %p142_p0 }
   0x9   :  { %150 = shalt.err (!%p147_p2)
}
   0xa   :  { %s151_s23 = scalar_lea.vmem %s28_s13, 128  ;;  %p156_p4 = scmp.lt.s32.totalorder %s28_s13, %s28_s13 }
   0xb   :  { %p152_p3 = scmp.ne.s32.totalorder %s28_s13, %s151_s23  ;;  %p157_p5 = scmp.lt.s32.totalorder %s151_s23, %s151_s23 }
   0xd   :  { %p158_p6 = por %p157_p5, %p156_p4 }
   0xf   :  { %p159_p7 = pnand %p158_p6, %p152_p3 }
  0x11   :  { %162 = shalt.err (!%p159_p7)
}
  0x12   :  { %30 = dma.hbm_to_vmem [thread:$0]  %s312_s1, 128, %s28_s13, [#allocation6]  }
  0x13   :  { %s163_s28 = scalar_lea.hbm %s311_s0, 128 }
  0x14   :  { %p164_p8 = scmp.ne.s32.totalorder %s311_s0, %s163_s28  ;;  %p167_p9 = scmp.lt.u32.totalorder %s163_s28, %s311_s0 }
  0x16   :  { %p169_p10 = pnand %p167_p9, %p164_p8 }
  0x18   :  { %172 = shalt.err (!%p169_p10)
}
  0x19   :  { %s173_s6 = scalar_lea.vmem %s18_s15, 128  ;;  %p178_p12 = scmp.lt.s32.totalorder %s18_s15, %s18_s15 }
  0x1a   :  { %p174_p11 = scmp.ne.s32.totalorder %s18_s15, %s173_s6  ;;  %p179_p13 = scmp.lt.s32.totalorder %s173_s6, %s173_s6 }
  0x1c   :  { %p180_p0 = por %p179_p13, %p178_p12 }
  0x1e   :  { %p181_p1 = pnand %p180_p0, %p174_p11 }
  0x20   :  { %184 = shalt.err (!%p181_p1)
}
  0x21   :  { %20 = dma.hbm_to_vmem [thread:$0]  %s311_s0, 128, %s18_s15, [#allocation3]  }
  0x22   :  { %s237_s8 = smov [#allocation7]   ;;  %s185_s12 = scalar_lea.hbm %s313_s2, 128 }
  0x23   :  { %s37_s9 = sshll.u32 %s237_s8, 4  ;;  %p186_p2 = scmp.ne.s32.totalorder %s313_s2, %s185_s12  ;;  %s38_s9 = int_to_ptr.vmem [resolvable:$true] %s37_s9 }
  0x24   :  { %p189_p3 = scmp.lt.u32.totalorder %s185_s12, %s313_s2 }
  0x26   :  { %p191_p4 = pnand %p189_p3, %p186_p2 }
  0x28   :  { %194 = shalt.err (!%p191_p4)
}
  0x29   :  { %s195_s18 = scalar_lea.vmem %s38_s9, 128  ;;  %p200_p6 = scmp.lt.s32.totalorder %s38_s9, %s38_s9 }
  0x2a   :  { %p196_p5 = scmp.ne.s32.totalorder %s38_s9, %s195_s18  ;;  %p201_p7 = scmp.lt.s32.totalorder %s195_s18, %s195_s18 }
  0x2c   :  { %p202_p8 = por %p201_p7, %p200_p6 }
  0x2e   :  { %p203_p9 = pnand %p202_p8, %p196_p5 }
  0x30   :  { %206 = shalt.err (!%p203_p9)
}
  0x31   :  { %40 = dma.hbm_to_vmem [thread:$0]  %s313_s2, 128, %s38_s9, [#allocation6]  }
  0x32   :  { %229 = dma.done.wait [#allocation3], 128  }
  0x33   :  { %230 = vsyncadd [#allocation3], 4294967168 }
  0x34   :  { %231 = dma.done.wait [#allocation6], 256  }
  0x35   :  { %232 = vsyncadd [#allocation6], 4294967040  ;;  %v56_v0 = vld [vmem:[#allocation2] sm:$0xff]  ;;  %v57_v1 = vld [vmem:[#allocation5] sm:$0xff]  ;;  %v79_v10 = vlaneseq  ;;  %vm54_vm1 = vcmask 0   ;;  %v238_v28 = vmov 0.0  }
  0x36   :  { %v59_v2 = vsub.f32 %v56_v0, %v57_v1  ;;  %v58_v13 = vld [vmem:[#allocation7] sm:$0xff]  ;;  %55 = vst.msk [vmem:[#allocation8] sm:$0x1] %vm54_vm1, %v238_v28  ;;  %s239_s19 = smov [#allocation8]  }
  0x37   :  { %v80_v11 = vshrl.u32 %v79_v10, 7  ;;  %v82_v16 = vand.u32 127, %v79_v10  ;;  %v75_v20 = vsub.f32 1.0, %v58_v13  ;;  %s116_s20 = sshll.u32 %s239_s19, 4  ;;  %s117_s20 = int_to_ptr.vmem [resolvable:$true] %s116_s20 }
  0x38   :  { %v60_v3 = vmul.f32 0.1, %v59_v2  ;;  %s207_s21 = scalar_lea.vmem %s117_s20, 16  ;;  %s211_s22 = scalar_lea.vmem %s117_s20, 32 }
  0x39   :  { %v86_v17 = vmul.u32 128, %v80_v11  ;;  %p208_p10 = scmp.ne.s32.totalorder %s117_s20, %s207_s21  ;;  %p212_p11 = scmp.lt.s32.totalorder %s117_s20, %s117_s20 }
  0x3a   :  { %v61_v4 = vsub.f32 0.0, %v60_v3  ;;  %p213_p12 = scmp.lt.s32.totalorder %s211_s22, %s207_s21 }
  0x3b   :  { %v87_v23 = vadd.s32 %v86_v17, %v82_v16 }
  0x3c   :  { %v62_v5 = vmul.f32 1.442695, %v61_v4  ;;  %p214_p13 = por %p213_p12, %p212_p11 }
  0x3d   :  { %vm88_vm0 = vcmp.lt.s32.totalorder %v87_v23, 8  ;;  %v90_v36 = vld [vmem:[#allocation8] sm:$0x1] }
  0x3e   :  { %133 = vpow2.f32 %v62_v5  ;;  %p215_p0 = pnand %p214_p13, %p208_p10 }
  0x48   :  { %v134_v6 = vpop.eup %133 }
  0x49   :  { %v64_v7 = vadd.f32 1.0, %v134_v6 }
  0x4b   :  { %135 = vrcp.f32 %v64_v7 }
  0x55   :  { %v136_v8 = vpop.eup %135 }
  0x56   :  { %137 = vlog2.f32 %v136_v8  ;;  %v70_v9 = vsub.f32 1.0, %v136_v8 }
  0x58   :  { %139 = vlog2.f32 %v70_v9 }
  0x60   :  { %v138_v12 = vpop.eup %137 }
  0x61   :  { %v68_v14 = vmul.f32 0.6931472, %v138_v12 }
  0x62   :  { %v140_v15 = vpop.eup %139 }
  0x63   :  { %v69_v18 = vmax.f32 %v68_v14, -100.0  ;;  %v72_v19 = vmul.f32 0.6931472, %v140_v15 }
  0x65   :  { %v73_v21 = vmax.f32 %v72_v19, -100.0  ;;  %v74_v22 = vmul.f32 %v69_v18, %v58_v13 }
  0x67   :  { %v76_v24 = vmul.f32 %v75_v20, %v73_v21 }
  0x69   :  { %v77_v25 = vadd.f32 %v76_v24, %v74_v22 }
  0x6b   :  { %v78_v26 = vsub.f32 0.0, %v77_v25 }
  0x6d   :  { %v89_v27 = vsel %vm88_vm0, %v78_v26, 0.0 }
  0x6e   :  { %91 = vadd.xlane.f32.xlu0 %v89_v27 }
  0xfb   :  { %v92_v29 = vpop.xlane.xlu0 %91 }
  0xfc   :  { %v93_v30 = vrot.slane %v92_v29, 4 }
  0xfe   :  { %v94_v31 = vadd.f32 %v93_v30, %v92_v29 }
 0x100   :  { %v95_v32 = vrot.slane %v94_v31, 2 }
 0x102   :  { %v96_v33 = vadd.f32 %v95_v32, %v94_v31 }
 0x104   :  { %v97_v34 = vrot.slane %v96_v33, 1 }
 0x106   :  { %v98_v35 = vadd.f32 %v97_v34, %v96_v33 }
 0x108   :  { %126 = vpush %v98_v35 }
 0x139   :  { %s127_s2 = spop %126 }
 0x13a   :  { %v100_v37 = vstv %s127_s2 }
 0x13b   :  { %v101_v38 = vadd.f32 %v100_v37, %v90_v36 }
 0x13d   :  { %103 = vst.msk [vmem:[#allocation8] sm:$0x1] %vm54_vm1, %v101_v38 }
 0x144   :  { %v107_v39 = vld [vmem:[#allocation8] sm:$0x1] }
 0x145   :  { %v108_v40 = vmul.f32 0.125, %v107_v39 }
 0x147   :  { %109 = vst.msk [vmem:[#allocation8] sm:$0x1] %vm54_vm1, %v108_v40 }
 0x148   :  { %218 = shalt.err (!%p215_p0)
}
 0x149   :  { %s219_s25 = scalar_lea.hbm %s314_s3, 16 }
 0x14a   :  { %p220_p1 = scmp.ne.s32.totalorder %s314_s3, %s219_s25  ;;  %p223_p2 = scmp.lt.u32.totalorder %s219_s25, %s314_s3 }
 0x14c   :  { %p225_p3 = pnand %p223_p2, %p220_p1 }
 0x14e   :  { %228 = shalt.err (!%p225_p3)
}
 0x14f   :  { %119 = dma.vmem_to_hbm [thread:$0]  %s117_s20, 16, %s314_s3, [#allocation4]  }
 0x150   :  { %233 = dma.done.wait [#allocation4], 16  }
 0x151   :  { %234 = vsyncadd [#allocation4], 4294967280 }
 0x152   :  { %123 = vsyncpa [#allocation3], 1 }
 0x153   :  { %124 = vsyncpa [#allocation6], 1 }
 0x154   :  { %125 = vsyncpa [#allocation4], 1 }

</bundles_post_ra>
